<compile_context>
chip_gen: v7x
topology: tpu7x:2x2x1
jax: 0.10.0
libtpu: 0.0.40
codegen_flags: <defaults>
</compile_context>

<pallas_src>
import jax
import jax.numpy as jnp
from jax.experimental import pallas as pl
from jax.experimental.pallas import tpu as pltpu


def _downsamp_kernel(x_ref, o_ref):
    # Input block holds in_lanes >= nv_prev lanes; keep the first nv_prev.
    # When in_lanes == nv_prev this is an identity slice (pure copy).
    o_ref[...] = x_ref[..., : o_ref.shape[-1]]


def _sublane_multiple(dtype) -> int:
    # Rows per packed sublane group: f32 -> 8, bf16 -> 16, int8/fp8 -> 32.
    return max(8, 32 // jnp.dtype(dtype).itemsize)


def downsamp(x: jax.Array, nv_prev: int) -> jax.Array:
    """Pallas equivalent of DownSamp(nv_prev)(x) == x[..., :nv_prev]."""
    *lead, NV = x.shape
    assert 0 < nv_prev <= NV

    # Identity case: nothing to move.
    if nv_prev == NV:
        return x

    # Tiny levels (nv_prev < 128, e.g. 42 or 12): masked narrow stores and
    # fixed kernel-launch overhead dominate -> let XLA do the slice.
    if nv_prev < 128:
        return x[..., :nv_prev]

    rows = 1
    for d in lead:
        rows *= d
    x2 = x.reshape(rows, NV)

    itemsize = jnp.dtype(x.dtype).itemsize
    sub = _sublane_multiple(x.dtype)

    # Read window: next 128-lane multiple >= nv_prev, clamped to full extent.
    # Always a legal block last-dim, and never wider than needed + 127 lanes.
    in_lanes = min(NV, pl.cdiv(nv_prev, 128) * 128)

    # Row-tile sizing: ~4 MiB input blocks.  Double-buffered in+out then stays
    # <= ~16 MiB, under every generation's scoped-VMEM limit.
    if rows <= sub:
        R = rows  # full extent along rows: always legal
    else:
        target_in_bytes = 4 << 20
        r_target = max(sub, target_in_bytes // max(1, in_lanes * itemsize))
        R = min(rows, r_target)
        R = max(sub, (R // sub) * sub)
        # Keep >= 4 grid steps when rows allow it, so the "parallel" axis can
        # actually split across v7x's two TensorCores.
        if rows >= 4 * sub:
            r_quarter = max(sub, (pl.cdiv(rows, 4) // sub) * sub)
            R = min(R, r_quarter)
    grid = (pl.cdiv(rows, R),)

    out2 = pl.pallas_call(
        _downsamp_kernel,
        out_shape=jax.ShapeDtypeStruct((rows, nv_prev), x.dtype),
        grid_spec=pltpu.PrefetchScalarGridSpec(
            num_scalar_prefetch=0,
            grid=grid,
            in_specs=[pl.BlockSpec((R, in_lanes), lambda i: (i, 0))],
            out_specs=pl.BlockSpec((R, nv_prev), lambda i: (i, 0)),
        ),
        compiler_params=pltpu.CompilerParams(
            dimension_semantics=("parallel",),
            vmem_limit_bytes=32 << 20,
        ),
    )(x2)

    return out2.reshape(*lead, nv_prev)


def _check(x, nv_prev):
    out = downsamp(x, nv_prev)
    jax.block_until_ready(out)
    ref = x[..., :nv_prev]
    assert out.shape == ref.shape, (out.shape, ref.shape)
    assert out.dtype == x.dtype
    assert bool(jnp.array_equal(out, ref))
    return out


if __name__ == "__main__":
    key = jax.random.PRNGKey(0)
    k1, k2, k3, k4 = jax.random.split(key, 4)

    # 1) Realistic icosahedral level: NV=2562 -> nv_prev=642 (not 128-aligned,
    #    exercises the rounded-up 768-lane read window).
    x1 = jax.random.normal(k1, (2, 8, 2562), dtype=jnp.float32)
    _check(x1, 642)

    # 2) Lane-aligned nv_prev (exact-width read, pure copy kernel).
    x2 = jax.random.normal(k2, (2, 4, 512), dtype=jnp.float32)
    _check(x2, 256)

    # 3) Ragged rows (rows=21 not a multiple of 8): partial last grid block.
    x3 = jax.random.normal(k3, (3, 7, 640), dtype=jnp.float32)
    _check(x3, 256)

    # 4) Larger row count: multi-step grid (>=4 steps) + bf16 sublane packing.
    x4 = jax.random.normal(k4, (4, 16, 896), dtype=jnp.bfloat16)
    _check(x4, 384)

    # 5) Tiny level (nv_prev=42) -> XLA-slice fallback; identity (nv_prev=NV).
    _check(x2, 42)
    assert downsamp(x2, 512) is x2

    print("KERNEL_OK")
</pallas_src>

<mosaic_0001>
module attributes {stable_mosaic.version = 11 : i64} {
  func.func @_downsamp_kernel(%arg0: i32, %arg1: memref<16x768xf32, #tpu.memory_space<vmem>>, %arg2: memref<16x642xf32, #tpu.memory_space<vmem>>) attributes {dimension_semantics = [#tpu.dimension_semantics<parallel>], iteration_bounds = array<i64: 1>, scalar_prefetch = 0 : i64, scratch_operands = 0 : i64, tpu.core_type = #tpu.core_type<tc>, window_params = [{transform_indices = @transform_0, window_bounds = array<i64: 16, 768>}, {transform_indices = @transform_1, window_bounds = array<i64: 16, 642>}]} {
    %c0 = arith.constant 0 : index
    %c0_0 = arith.constant 0 : index
    %0 = vector.load %arg1[%c0, %c0_0] : memref<16x768xf32, #tpu.memory_space<vmem>>, vector<16x642xf32>
    %c0_1 = arith.constant 0 : index
    %c0_2 = arith.constant 0 : index
    %1 = vector.load %arg2[%c0_1, %c0_2] : memref<16x642xf32, #tpu.memory_space<vmem>>, vector<16x642xf32>
    tpu.vector_store %arg2[%c0_1, %c0_2], %0 {strides = array<i32>} : memref<16x642xf32, #tpu.memory_space<vmem>>, vector<16x642xf32>,
    return
  }
  func.func @transform_0(%arg0: i32) -> (i32, i32) {
    %c0_i32 = arith.constant 0 : i32
    %c0_i32_0 = arith.constant 0 : i32
    return %arg0, %c0_i32 : i32, i32
  }
  func.func @transform_1(%arg0: i32) -> (i32, i32) {
    %c0_i32 = arith.constant 0 : i32
    %c0_i32_0 = arith.constant 0 : i32
    return %arg0, %c0_i32 : i32, i32
  }
}

</mosaic_0001>

<bundles_post_ra>
// kernel: tpu_custom_call.1
= control target key start
LH: loop header
LB: loop body
LE: loop exit
PB: predicated region body
PF: predicated region fallthrough
CT: control target
= control target key end

     0   :  { %6 = vsyncpa [#allocation3], 0  ;;  %s167_s0 = inlined_call_operand.hbm [shape: f32[16,2562], index: 0, kind: input, shape index: {}]   ;;  %s168_s1 = inlined_call_operand.hbm [shape: f32[16,642], index: 1, kind: output, shape index: {}]  }
   0x1   :  { %7 = vsyncpa [#allocation4], 0  ;;  %s118_s6 = smov [#allocation2]   ;;  %s70_s10 = scalar_lea.hbm %s167_s0, 1536 }
   0x2   :  { %s13_s7 = sshll.u32 %s118_s6, 4  ;;  %p71_p0 = scmp.ne.s32.totalorder %s167_s0, %s70_s10  ;;  %s14_s7 = int_to_ptr.vmem [resolvable:$true] %s13_s7 }
   0x3   :  { %s72_s15 = scalar_lea.hbm %s167_s0, 5376  ;;  %p74_p2 = scmp.lt.u32.totalorder %s70_s10, %s167_s0 }
   0x4   :  { %p73_p1 = scmp.lt.u32.totalorder %s72_s15, %s70_s10 }
   0x6   :  { %p75_p3 = por %p74_p2, %p73_p1 }
   0x8   :  { %p76_p4 = pnand %p75_p3, %p71_p0 }
   0xa   :  { %79 = shalt.err (!%p76_p4)
}
   0xb   :  { %s80_s18 = scalar_lea.vmem %s14_s7, 1536  ;;  %p85_p6 = scmp.lt.s32.totalorder %s14_s7, %s14_s7 }
   0xc   :  { %p81_p5 = scmp.ne.s32.totalorder %s14_s7, %s80_s18  ;;  %p86_p7 = scmp.lt.s32.totalorder %s80_s18, %s80_s18 }
   0xe   :  { %p87_p8 = por %p86_p7, %p85_p6 }
  0x10   :  { %p88_p9 = pnand %p87_p8, %p81_p5 }
  0x12   :  { %91 = shalt.err (!%p88_p9)
}
  0x13   :  { %s119_s19 = smov 2688   ;;  %s120_s20 = smov 768  }
  0x14   :  { %s121_s21 = smov 48  }
  0x15   :  { %19 = dma.hbm_to_vmem [thread:$0]  %s167_s0, 1536, %s14_s7, [#allocation3], %s119_s19, %s120_s20, %s121_s21  }
  0x16   :  { %114 = dma.done.wait [#allocation3], 1536  }
  0x17   :  { %115 = vsyncadd [#allocation3], 4294965760  ;;  %vm40_vm0 = vcmask 15360   ;;  %s122_s24 = smov [#allocation5]   ;;  %v23_v0 = vld [vmem:[#allocation2] sm:$0xff]  ;;  %v24_v1 = vld [vmem:[#allocation2 + $0x8] sm:$0xff] }
  0x18   :  { %s53_s25 = sshll.u32 %s122_s24, 4  ;;  %v25_v2 = vld [vmem:[#allocation2 + $0x10] sm:$0xff]  ;;  %35 = vst [vmem:[#allocation5] sm:$0xff] %v23_v0  ;;  %36 = vst [vmem:[#allocation5 + $0x8] sm:$0xff] %v24_v1  ;;  %v26_v3 = vld [vmem:[#allocation2 + $0x18] sm:$0xff]  ;;  %s54_s25 = int_to_ptr.vmem [resolvable:$true] %s53_s25 }
  0x19   :  { %37 = vst [vmem:[#allocation5 + $0x10] sm:$0xff] %v25_v2  ;;  %v27_v4 = vld [vmem:[#allocation2 + $0x20] sm:$0xff]  ;;  %v28_v5 = vld [vmem:[#allocation2 + $0x28] sm:$0xff]  ;;  %38 = vst [vmem:[#allocation5 + $0x18] sm:$0xff] %v26_v3  ;;  %s92_s0 = scalar_lea.vmem %s54_s25, 1536  ;;  %p97_p11 = scmp.lt.s32.totalorder %s54_s25, %s54_s25 }
  0x1a   :  { %39 = vst [vmem:[#allocation5 + $0x20] sm:$0xff] %v27_v4  ;;  %41 = vst.msk [vmem:[#allocation5 + $0x28] sm:$0xff] %vm40_vm0, %v28_v5  ;;  %v29_v6 = vld [vmem:[#allocation2 + $0x30] sm:$0xff]  ;;  %v30_v7 = vld [vmem:[#allocation2 + $0x38] sm:$0xff]  ;;  %p93_p10 = scmp.ne.s32.totalorder %s54_s25, %s92_s0  ;;  %p98_p12 = scmp.lt.s32.totalorder %s92_s0, %s92_s0 }
  0x1b   :  { %v31_v8 = vld [vmem:[#allocation2 + $0x40] sm:$0xff]  ;;  %42 = vst [vmem:[#allocation5 + $0x30] sm:$0xff] %v29_v6  ;;  %43 = vst [vmem:[#allocation5 + $0x38] sm:$0xff] %v30_v7  ;;  %v32_v9 = vld [vmem:[#allocation2 + $0x48] sm:$0xff] }
  0x1c   :  { %44 = vst [vmem:[#allocation5 + $0x40] sm:$0xff] %v31_v8  ;;  %v33_v10 = vld [vmem:[#allocation2 + $0x50] sm:$0xff]  ;;  %v34_v11 = vld [vmem:[#allocation2 + $0x58] sm:$0xff]  ;;  %45 = vst [vmem:[#allocation5 + $0x48] sm:$0xff] %v32_v9  ;;  %p99_p13 = por %p98_p12, %p97_p11 }
  0x1d   :  { %46 = vst [vmem:[#allocation5 + $0x50] sm:$0xff] %v33_v10  ;;  %47 = vst.msk [vmem:[#allocation5 + $0x58] sm:$0xff] %vm40_vm0, %v34_v11 }
  0x1e   :  { %p100_p0 = pnand %p99_p13, %p93_p10 }
  0x20   :  { %103 = shalt.err (!%p100_p0)
}
  0x21   :  { %s104_s28 = scalar_lea.hbm %s168_s1, 1536 }
  0x22   :  { %p105_p1 = scmp.ne.s32.totalorder %s168_s1, %s104_s28  ;;  %p108_p2 = scmp.lt.u32.totalorder %s104_s28, %s168_s1 }
  0x24   :  { %p110_p3 = pnand %p108_p2, %p105_p1 }
  0x26   :  { %113 = shalt.err (!%p110_p3)
}
  0x27   :  { %59 = dma.vmem_to_hbm [thread:$0]  %s54_s25, 1536, %s168_s1, [#allocation4], %s120_s20, %s120_s20, %s121_s21  }
  0x28   :  { %116 = dma.done.wait [#allocation4], 1536  }
  0x29   :  { %117 = vsyncadd [#allocation4], 4294965760 }
  0x2a   :  { %63 = vsyncpa [#allocation3], 1 }
  0x2b   :  { %64 = vsyncpa [#allocation4], 1 }

</bundles_post_ra>
